<compile_context>
chip_gen: v7x
topology: tpu7x:2x2x1
jax: 0.10.0
libtpu: 0.0.40
codegen_flags: <defaults>
</compile_context>

<pallas_src>
import functools

import jax
import jax.numpy as jnp
from jax.experimental import pallas as pl
from jax.experimental.pallas import tpu as pltpu


def _round_up(n, m):
    return ((n + m - 1) // m) * m


def _cdiv(a, b):
    return -(-a // b)


_LAYER_ORDER = ("enc_1", "enc_2", "enc_3", "z_layer",
                "dec_1", "dec_2", "dec_3", "x_bar_layer")


def prepare_params(params):
    """Cast weights to bf16 / biases to f32 once, outside the per-call path."""
    out = {}
    for name in _LAYER_ORDER:
        w, b = params[name]
        out[name] = (jnp.asarray(w, jnp.bfloat16), jnp.asarray(b, jnp.float32))
    return out


def _ae_kernel(
    x_ref,
    w1_ref, b1_ref, w2_ref, b2_ref, w3_ref, b3_ref,
    wz_ref, bz_ref,
    wd1_ref, bd1_ref, wd2_ref, bd2_ref, wd3_ref, bd3_ref,
    wx_ref, bx_ref,
    out_ref,
    *, offsets, padded,
):
    off_h1, off_h2, off_xbar, off_h3, off_z = offsets

    def linear(a_bf16, w_ref, b_ref):
        # bf16 operands into the MXU, f32 accumulation, f32 bias add.
        return (jnp.dot(a_bf16, w_ref[...], preferred_element_type=jnp.float32)
                + b_ref[...])

    def relu_bf16(v_f32):
        # one cast serves both the slab store and the next matmul's LHS
        return jnp.maximum(v_f32, 0.0).astype(jnp.bfloat16)

    x = x_ref[...]                                     # already bf16

    # encoder — store each activation into the slab as soon as it is computed
    h1 = relu_bf16(linear(x, w1_ref, b1_ref))
    out_ref[:, off_h1:off_h1 + w1_ref.shape[1]] = h1
    h2 = relu_bf16(linear(h1, w2_ref, b2_ref))
    out_ref[:, off_h2:off_h2 + w2_ref.shape[1]] = h2
    h3 = relu_bf16(linear(h2, w3_ref, b3_ref))
    out_ref[:, off_h3:off_h3 + w3_ref.shape[1]] = h3

    # z = softmax(z_layer(h3), dim=1) in f32 with an exact divide
    logits = linear(h3, wz_ref, bz_ref)
    m = jnp.max(logits, axis=-1, keepdims=True)
    e = jnp.exp(logits - m)
    z = (e / jnp.sum(e, axis=-1, keepdims=True)).astype(jnp.bfloat16)

    # single store covering [z | lane-padding tail] at the end of the slab
    n_z = wz_ref.shape[1]
    tail = padded - off_z
    z_store = z
    if tail > n_z:
        z_store = jnp.concatenate(
            [z, jnp.zeros((z.shape[0], tail - n_z), jnp.bfloat16)], axis=-1)
    out_ref[:, off_z:padded] = z_store

    # decoder
    d1 = relu_bf16(linear(z, wd1_ref, bd1_ref))
    d2 = relu_bf16(linear(d1, wd2_ref, bd2_ref))
    d3 = relu_bf16(linear(d2, wd3_ref, bd3_ref))
    x_bar = linear(d3, wx_ref, bx_ref).astype(jnp.bfloat16)
    out_ref[:, off_xbar:off_xbar + wx_ref.shape[1]] = x_bar


def ae_forward(x, params, *, bm=1024):
    """Fused AE forward pass.

    x: [B, n_input] (any float dtype; cast to bf16 as the kernel input)
    params: dict name -> (w [in,out], b [1,out]).  Pre-cast once with
            prepare_params() to avoid per-call cast ops.
    Returns (x_bar, enc_h1, enc_h2, enc_h3, z) as float32, matching the module.

    bm: target batch tile (multiple of 16).  Layer widths here are <= 64, so
    the kernel is HBM-/step-overhead bound: sweep bm in 1024-2048.  The actual
    tile is picked near a divisor of the 16-padded batch (small padding), and
    the step count is kept even when the batch is large enough so both v7x
    TensorCores get balanced work.
    """
    assert bm % 16 == 0, "batch tile must be a multiple of 16 (bf16 sublane pack)"
    B, n_input = x.shape
    x = x.astype(jnp.bfloat16)

    flat_params = []
    layer_dims = []
    for name in _LAYER_ORDER:
        w, b = params[name]
        if w.dtype != jnp.bfloat16:
            w = w.astype(jnp.bfloat16)     # no-op if prepare_params() was used
        if b.dtype != jnp.float32:
            b = b.astype(jnp.float32)
        flat_params += [w, b]
        layer_dims.append((w.shape[0], w.shape[1]))

    (_, n_enc_1), (_, n_enc_2), (_, n_enc_3), (_, n_z), \
        (_, n_dec_1), (_, n_dec_2), (_, n_dec_3), (_, n_out) = layer_dims
    assert n_out == n_input

    # ---- lane-friendly packed bf16 output slab: [h1 | h2 | x_bar | h3 | z | pad]
    off_h1 = 0
    off_h2 = off_h1 + n_enc_1
    off_xbar = off_h2 + n_enc_2
    off_h3 = off_xbar + n_out
    off_z = off_h3 + n_enc_3
    total = off_z + n_z
    padded = max(_round_up(total, 128), 128)
    offsets = (off_h1, off_h2, off_xbar, off_h3, off_z)

    # ---- batch tiling: pad only to 16, balance blocks, keep step count even
    B16 = _round_up(max(B, 1), 16)
    bm_cap = max(16, min(_round_up(bm, 16), B16))
    grid_n = _cdiv(B16, bm_cap)
    if B16 >= 256 and grid_n % 2 == 1:
        grid_n += 1                        # even step count -> balanced v7x TCs
    bm_eff = _round_up(_cdiv(B16, grid_n), 16)
    B_pad = grid_n * bm_eff
    if B_pad != B:
        x = jnp.pad(x, ((0, B_pad - B), (0, 0)))
    grid = (grid_n,)

    x_spec = pl.BlockSpec((bm_eff, n_input), lambda i: (i, 0))
    # Every weight/bias is a single full grid-resident block.
    param_specs = [pl.BlockSpec(p.shape, lambda i: (0, 0)) for p in flat_params]
    out_spec = pl.BlockSpec((bm_eff, padded), lambda i: (i, 0))
    out_shape = jax.ShapeDtypeStruct((B_pad, padded), jnp.bfloat16)

    # ---- explicit scoped-VMEM limit so the big tile isn't capped by defaults
    param_bytes = sum(int(p.size) * p.dtype.itemsize for p in flat_params)
    max_width = max(max(do for _, do in layer_dims), 128)
    needed = (2 * (bm_eff * n_input * 2 + bm_eff * padded * 2)   # dbl-buffered I/O
              + 2 * param_bytes
              + 8 * bm_eff * max_width * 4)                      # f32 temporaries
    vmem_limit = int(min(max(2 * needed, 32 << 20), 48 << 20))

    # Advisory cost estimate for the XLA scheduler.
    flops = 2 * B_pad * sum(di * do for di, do in layer_dims)
    transcendentals = B_pad * n_z                                # exp in softmax
    bytes_accessed = B_pad * n_input * 2 + param_bytes + B_pad * padded * 2

    kernel = functools.partial(_ae_kernel, offsets=offsets, padded=padded)

    fn = pl.pallas_call(
        kernel,
        out_shape=out_shape,
        grid_spec=pltpu.PrefetchScalarGridSpec(
            num_scalar_prefetch=0,
            grid=grid,
            in_specs=[x_spec] + param_specs,
            out_specs=out_spec,
        ),
        compiler_params=pltpu.CompilerParams(
            dimension_semantics=("parallel",),
            vmem_limit_bytes=vmem_limit,
        ),
        cost_estimate=pl.CostEstimate(
            flops=flops,
            transcendentals=transcendentals,
            bytes_accessed=bytes_accessed,
        ),
    )
    slab = fn(x, *flat_params)

    f32 = jnp.float32
    x_bar = slab[:B, off_xbar:off_xbar + n_input].astype(f32)
    h1 = slab[:B, off_h1:off_h1 + n_enc_1].astype(f32)
    h2 = slab[:B, off_h2:off_h2 + n_enc_2].astype(f32)
    h3 = slab[:B, off_h3:off_h3 + n_enc_3].astype(f32)
    z = slab[:B, off_z:off_z + n_z].astype(f32)
    return x_bar, h1, h2, h3, z


def init_params(key, n_enc_1, n_enc_2, n_enc_3, n_dec_1, n_dec_2, n_dec_3,
                n_input, n_z):
    """Deterministic synthetic init (not a checkpoint). Weights as [in, out]."""
    dims = {
        "enc_1": (n_input, n_enc_1),
        "enc_2": (n_enc_1, n_enc_2),
        "enc_3": (n_enc_2, n_enc_3),
        "z_layer": (n_enc_3, n_z),
        "dec_1": (n_z, n_dec_1),
        "dec_2": (n_dec_1, n_dec_2),
        "dec_3": (n_dec_2, n_dec_3),
        "x_bar_layer": (n_dec_3, n_input),
    }
    params = {}
    for name, (din, dout) in dims.items():
        key, kw, kb = jax.random.split(key, 3)
        bound = 1.0 / jnp.sqrt(jnp.float32(din))
        w = jax.random.uniform(kw, (din, dout), jnp.float32, -bound, bound)
        b = jax.random.uniform(kb, (1, dout), jnp.float32, -bound, bound)
        params[name] = (w, b)
    return params


def ae_reference(x, params):
    """Plain-JAX reference mirroring the kernel's bf16-matmul / f32-accumulate math."""
    def lin(a, name):
        w, b = params[name]
        return jnp.dot(a.astype(jnp.bfloat16), w.astype(jnp.bfloat16),
                       preferred_element_type=jnp.float32) + b.astype(jnp.float32)

    h1 = jax.nn.relu(lin(x, "enc_1"))
    h2 = jax.nn.relu(lin(h1, "enc_2"))
    h3 = jax.nn.relu(lin(h2, "enc_3"))
    z = jax.nn.softmax(lin(h3, "z_layer"), axis=1)
    d1 = jax.nn.relu(lin(z, "dec_1"))
    d2 = jax.nn.relu(lin(d1, "dec_2"))
    d3 = jax.nn.relu(lin(d2, "dec_3"))
    x_bar = lin(d3, "x_bar_layer")
    return x_bar, h1, h2, h3, z


if __name__ == "__main__":
    # Small shapes consistent with the module's forward (x: [batch, n_input]).
    n_input = 32
    n_enc_1, n_enc_2, n_enc_3 = 64, 64, 32
    n_z = 8
    n_dec_1, n_dec_2, n_dec_3 = 32, 64, 64

    key = jax.random.PRNGKey(0)
    kx, kx2, kp = jax.random.split(key, 3)
    params = prepare_params(init_params(kp, n_enc_1, n_enc_2, n_enc_3,
                                        n_dec_1, n_dec_2, n_dec_3, n_input, n_z))

    # single-block case + a multi-block case exercising the even-grid / padding path
    x_small = jax.random.normal(kx, (16, n_input), jnp.float32)
    x_big = jax.random.normal(kx2, (600, n_input), jnp.float32)

    for x in (x_small, x_big):
        outs = jax.block_until_ready(ae_forward(x, params))
        refs = ae_reference(x, params)
        for o, r in zip(outs, refs):
            assert o.shape == r.shape and o.dtype == r.dtype
            # bf16 matmul operands + bf16 output slab -> compare at ~3e-2 tolerance
            assert jnp.allclose(o, r, atol=3e-2, rtol=3e-2), "mismatch vs reference"

    print("KERNEL_OK")
</pallas_src>

<mosaic_0001>
module attributes {stable_mosaic.version = 11 : i64} {
  func.func @_ae_kernel(%arg0: i32, %arg1: memref<16x32xbf16, #tpu.memory_space<vmem>>, %arg2: memref<32x64xbf16, #tpu.memory_space<vmem>>, %arg3: memref<1x64xf32, #tpu.memory_space<vmem>>, %arg4: memref<64x64xbf16, #tpu.memory_space<vmem>>, %arg5: memref<1x64xf32, #tpu.memory_space<vmem>>, %arg6: memref<64x32xbf16, #tpu.memory_space<vmem>>, %arg7: memref<1x32xf32, #tpu.memory_space<vmem>>, %arg8: memref<32x8xbf16, #tpu.memory_space<vmem>>, %arg9: memref<1x8xf32, #tpu.memory_space<vmem>>, %arg10: memref<8x32xbf16, #tpu.memory_space<vmem>>, %arg11: memref<1x32xf32, #tpu.memory_space<vmem>>, %arg12: memref<32x64xbf16, #tpu.memory_space<vmem>>, %arg13: memref<1x64xf32, #tpu.memory_space<vmem>>, %arg14: memref<64x64xbf16, #tpu.memory_space<vmem>>, %arg15: memref<1x64xf32, #tpu.memory_space<vmem>>, %arg16: memref<64x32xbf16, #tpu.memory_space<vmem>>, %arg17: memref<1x32xf32, #tpu.memory_space<vmem>>, %arg18: memref<16x256xbf16, #tpu.memory_space<vmem>>) attributes {dimension_semantics = [#tpu.dimension_semantics<parallel>], iteration_bounds = array<i64: 1>, scalar_prefetch = 0 : i64, scratch_operands = 0 : i64, tpu.core_type = #tpu.core_type<tc>, window_params = [{transform_indices = @transform_0, window_bounds = array<i64: 16, 32>}, {pipeline_mode = #tpu.pipeline_mode<synchronous>, transform_indices = @transform_1, window_bounds = array<i64: 32, 64>}, {pipeline_mode = #tpu.pipeline_mode<synchronous>, transform_indices = @transform_2, window_bounds = array<i64: 1, 64>}, {pipeline_mode = #tpu.pipeline_mode<synchronous>, transform_indices = @transform_3, window_bounds = array<i64: 64, 64>}, {pipeline_mode = #tpu.pipeline_mode<synchronous>, transform_indices = @transform_4, window_bounds = array<i64: 1, 64>}, {pipeline_mode = #tpu.pipeline_mode<synchronous>, transform_indices = @transform_5, window_bounds = array<i64: 64, 32>}, {pipeline_mode = #tpu.pipeline_mode<synchronous>, transform_indices = @transform_6, window_bounds = array<i64: 1, 32>}, {pipeline_mode = #tpu.pipeline_mode<synchronous>, transform_indices = @transform_7, window_bounds = array<i64: 32, 8>}, {pipeline_mode = #tpu.pipeline_mode<synchronous>, transform_indices = @transform_8, window_bounds = array<i64: 1, 8>}, {pipeline_mode = #tpu.pipeline_mode<synchronous>, transform_indices = @transform_9, window_bounds = array<i64: 8, 32>}, {pipeline_mode = #tpu.pipeline_mode<synchronous>, transform_indices = @transform_10, window_bounds = array<i64: 1, 32>}, {pipeline_mode = #tpu.pipeline_mode<synchronous>, transform_indices = @transform_11, window_bounds = array<i64: 32, 64>}, {pipeline_mode = #tpu.pipeline_mode<synchronous>, transform_indices = @transform_12, window_bounds = array<i64: 1, 64>}, {pipeline_mode = #tpu.pipeline_mode<synchronous>, transform_indices = @transform_13, window_bounds = array<i64: 64, 64>}, {pipeline_mode = #tpu.pipeline_mode<synchronous>, transform_indices = @transform_14, window_bounds = array<i64: 1, 64>}, {pipeline_mode = #tpu.pipeline_mode<synchronous>, transform_indices = @transform_15, window_bounds = array<i64: 64, 32>}, {pipeline_mode = #tpu.pipeline_mode<synchronous>, transform_indices = @transform_16, window_bounds = array<i64: 1, 32>}, {transform_indices = @transform_17, window_bounds = array<i64: 16, 256>}]} {
    %c0 = arith.constant 0 : index
    %c0_0 = arith.constant 0 : index
    %0 = vector.load %arg1[%c0, %c0_0] : memref<16x32xbf16, #tpu.memory_space<vmem>>, vector<16x32xbf16>
    %c0_1 = arith.constant 0 : index
    %c0_2 = arith.constant 0 : index
    %1 = vector.load %arg2[%c0_1, %c0_2] : memref<32x64xbf16, #tpu.memory_space<vmem>>, vector<32x64xbf16>
    %cst = arith.constant dense<0.000000e+00> : vector<16x64xf32>
    %2 = tpu.matmul %0, %1, %cst {dimension_numbers = #tpu.dot_dimension_numbers<[1], [0], [0], [1], [0, 0, 1, 1], [], []>} : vector<16x32xbf16>, vector<32x64xbf16>, vector<16x64xf32> -> vector<16x64xf32>
    %c0_3 = arith.constant 0 : index
    %c0_4 = arith.constant 0 : index
    %3 = vector.load %arg3[%c0_3, %c0_4] : memref<1x64xf32, #tpu.memory_space<vmem>>, vector<1x64xf32>
    %4 = vector.broadcast %3 : vector<1x64xf32> to vector<16x64xf32>
    %5 = arith.addf %2, %4 : vector<16x64xf32>
    %cst_5 = arith.constant 0.000000e+00 : f32
    %6 = vector.broadcast %cst_5 : f32 to vector<16x64xf32>
    %7 = arith.maximumf %5, %6 : vector<16x64xf32>
    %8 = arith.truncf %7 : vector<16x64xf32> to vector<16x64xbf16>
    %c0_6 = arith.constant 0 : index
    %c0_7 = arith.constant 0 : index
    %9 = vector.load %arg18[%c0_6, %c0_7] : memref<16x256xbf16, #tpu.memory_space<vmem>>, vector<16x64xbf16>
    tpu.vector_store %arg18[%c0_6, %c0_7], %8 {strides = array<i32>} : memref<16x256xbf16, #tpu.memory_space<vmem>>, vector<16x64xbf16>,
    %c0_8 = arith.constant 0 : index
    %c0_9 = arith.constant 0 : index
    %10 = vector.load %arg4[%c0_8, %c0_9] : memref<64x64xbf16, #tpu.memory_space<vmem>>, vector<64x64xbf16>
    %cst_10 = arith.constant dense<0.000000e+00> : vector<16x64xf32>
    %11 = tpu.matmul %8, %10, %cst_10 {dimension_numbers = #tpu.dot_dimension_numbers<[1], [0], [0], [1], [0, 0, 1, 1], [], []>} : vector<16x64xbf16>, vector<64x64xbf16>, vector<16x64xf32> -> vector<16x64xf32>
    %c0_11 = arith.constant 0 : index
    %c0_12 = arith.constant 0 : index
    %12 = vector.load %arg5[%c0_11, %c0_12] : memref<1x64xf32, #tpu.memory_space<vmem>>, vector<1x64xf32>
    %13 = vector.broadcast %12 : vector<1x64xf32> to vector<16x64xf32>
    %14 = arith.addf %11, %13 : vector<16x64xf32>
    %cst_13 = arith.constant 0.000000e+00 : f32
    %15 = vector.broadcast %cst_13 : f32 to vector<16x64xf32>
    %16 = arith.maximumf %14, %15 : vector<16x64xf32>
    %17 = arith.truncf %16 : vector<16x64xf32> to vector<16x64xbf16>
    %c0_14 = arith.constant 0 : index
    %c64 = arith.constant 64 : index
    %18 = vector.load %arg18[%c0_14, %c64] : memref<16x256xbf16, #tpu.memory_space<vmem>>, vector<16x64xbf16>
    tpu.vector_store %arg18[%c0_14, %c64], %17 {strides = array<i32>} : memref<16x256xbf16, #tpu.memory_space<vmem>>, vector<16x64xbf16>,
    %c0_15 = arith.constant 0 : index
    %c0_16 = arith.constant 0 : index
    %19 = vector.load %arg6[%c0_15, %c0_16] : memref<64x32xbf16, #tpu.memory_space<vmem>>, vector<64x32xbf16>
    %cst_17 = arith.constant dense<0.000000e+00> : vector<16x32xf32>
    %20 = tpu.matmul %17, %19, %cst_17 {dimension_numbers = #tpu.dot_dimension_numbers<[1], [0], [0], [1], [0, 0, 1, 1], [], []>} : vector<16x64xbf16>, vector<64x32xbf16>, vector<16x32xf32> -> vector<16x32xf32>
    %c0_18 = arith.constant 0 : index
    %c0_19 = arith.constant 0 : index
    %21 = vector.load %arg7[%c0_18, %c0_19] : memref<1x32xf32, #tpu.memory_space<vmem>>, vector<1x32xf32>
    %22 = vector.broadcast %21 : vector<1x32xf32> to vector<16x32xf32>
    %23 = arith.addf %20, %22 : vector<16x32xf32>
    %cst_20 = arith.constant 0.000000e+00 : f32
    %24 = vector.broadcast %cst_20 : f32 to vector<16x32xf32>
    %25 = arith.maximumf %23, %24 : vector<16x32xf32>
    %26 = arith.truncf %25 : vector<16x32xf32> to vector<16x32xbf16>
    %c0_21 = arith.constant 0 : index
    %c160 = arith.constant 160 : index
    %27 = vector.load %arg18[%c0_21, %c160] : memref<16x256xbf16, #tpu.memory_space<vmem>>, vector<16x32xbf16>
    tpu.vector_store %arg18[%c0_21, %c160], %26 {strides = array<i32>} : memref<16x256xbf16, #tpu.memory_space<vmem>>, vector<16x32xbf16>,
    %c0_22 = arith.constant 0 : index
    %c0_23 = arith.constant 0 : index
    %28 = vector.load %arg8[%c0_22, %c0_23] : memref<32x8xbf16, #tpu.memory_space<vmem>>, vector<32x8xbf16>
    %cst_24 = arith.constant dense<0.000000e+00> : vector<16x8xf32>
    %29 = tpu.matmul %26, %28, %cst_24 {dimension_numbers = #tpu.dot_dimension_numbers<[1], [0], [0], [1], [0, 0, 1, 1], [], []>} : vector<16x32xbf16>, vector<32x8xbf16>, vector<16x8xf32> -> vector<16x8xf32>
    %c0_25 = arith.constant 0 : index
    %c0_26 = arith.constant 0 : index
    %30 = vector.load %arg9[%c0_25, %c0_26] : memref<1x8xf32, #tpu.memory_space<vmem>>, vector<1x8xf32>
    %31 = vector.broadcast %30 : vector<1x8xf32> to vector<16x8xf32>
    %32 = arith.addf %29, %31 : vector<16x8xf32>
    %cst_27 = arith.constant dense<0xFF800000> : vector<16xf32>
    %33 = vector.multi_reduction <maximumf>, %32, %cst_27 [1] : vector<16x8xf32> to vector<16xf32>
    %34 = vector.shape_cast %33 : vector<16xf32> to vector<16x1xf32>
    %35 = vector.broadcast %34 : vector<16x1xf32> to vector<16x8xf32>
    %36 = arith.subf %32, %35 : vector<16x8xf32>
    %37 = math.exp %36 : vector<16x8xf32>
    %cst_28 = arith.constant dense<0.000000e+00> : vector<16xf32>
    %38 = vector.multi_reduction <add>, %37, %cst_28 [1] : vector<16x8xf32> to vector<16xf32>
    %39 = vector.shape_cast %38 : vector<16xf32> to vector<16x1xf32>
    %40 = vector.broadcast %39 : vector<16x1xf32> to vector<16x8xf32>
    %41 = arith.divf %37, %40 : vector<16x8xf32>
    %42 = arith.truncf %41 : vector<16x8xf32> to vector<16x8xbf16>
    %cst_29 = arith.constant 0.000000e+00 : bf16
    %43 = vector.broadcast %cst_29 : bf16 to vector<16x56xbf16>
    %44 = tpu.concatenate %42, %43 in 1 : vector<16x8xbf16>, vector<16x56xbf16> -> vector<16x64xbf16>
    %c0_30 = arith.constant 0 : index
    %c192 = arith.constant 192 : index
    %45 = vector.load %arg18[%c0_30, %c192] : memref<16x256xbf16, #tpu.memory_space<vmem>>, vector<16x64xbf16>
    tpu.vector_store %arg18[%c0_30, %c192], %44 {strides = array<i32>} : memref<16x256xbf16, #tpu.memory_space<vmem>>, vector<16x64xbf16>,
    %c0_31 = arith.constant 0 : index
    %c0_32 = arith.constant 0 : index
    %46 = vector.load %arg10[%c0_31, %c0_32] : memref<8x32xbf16, #tpu.memory_space<vmem>>, vector<8x32xbf16>
    %cst_33 = arith.constant dense<0.000000e+00> : vector<16x32xf32>
    %47 = tpu.matmul %42, %46, %cst_33 {dimension_numbers = #tpu.dot_dimension_numbers<[1], [0], [0], [1], [0, 0, 1, 1], [], []>} : vector<16x8xbf16>, vector<8x32xbf16>, vector<16x32xf32> -> vector<16x32xf32>
    %c0_34 = arith.constant 0 : index
    %c0_35 = arith.constant 0 : index
    %48 = vector.load %arg11[%c0_34, %c0_35] : memref<1x32xf32, #tpu.memory_space<vmem>>, vector<1x32xf32>
    %49 = vector.broadcast %48 : vector<1x32xf32> to vector<16x32xf32>
    %50 = arith.addf %47, %49 : vector<16x32xf32>
    %cst_36 = arith.constant 0.000000e+00 : f32
    %51 = vector.broadcast %cst_36 : f32 to vector<16x32xf32>
    %52 = arith.maximumf %50, %51 : vector<16x32xf32>
    %53 = arith.truncf %52 : vector<16x32xf32> to vector<16x32xbf16>
    %c0_37 = arith.constant 0 : index
    %c0_38 = arith.constant 0 : index
    %54 = vector.load %arg12[%c0_37, %c0_38] : memref<32x64xbf16, #tpu.memory_space<vmem>>, vector<32x64xbf16>
    %cst_39 = arith.constant dense<0.000000e+00> : vector<16x64xf32>
    %55 = tpu.matmul %53, %54, %cst_39 {dimension_numbers = #tpu.dot_dimension_numbers<[1], [0], [0], [1], [0, 0, 1, 1], [], []>} : vector<16x32xbf16>, vector<32x64xbf16>, vector<16x64xf32> -> vector<16x64xf32>
    %c0_40 = arith.constant 0 : index
    %c0_41 = arith.constant 0 : index
    %56 = vector.load %arg13[%c0_40, %c0_41] : memref<1x64xf32, #tpu.memory_space<vmem>>, vector<1x64xf32>
    %57 = vector.broadcast %56 : vector<1x64xf32> to vector<16x64xf32>
    %58 = arith.addf %55, %57 : vector<16x64xf32>
    %cst_42 = arith.constant 0.000000e+00 : f32
    %59 = vector.broadcast %cst_42 : f32 to vector<16x64xf32>
    %60 = arith.maximumf %58, %59 : vector<16x64xf32>
    %61 = arith.truncf %60 : vector<16x64xf32> to vector<16x64xbf16>
    %c0_43 = arith.constant 0 : index
    %c0_44 = arith.constant 0 : index
    %62 = vector.load %arg14[%c0_43, %c0_44] : memref<64x64xbf16, #tpu.memory_space<vmem>>, vector<64x64xbf16>
    %cst_45 = arith.constant dense<0.000000e+00> : vector<16x64xf32>
    %63 = tpu.matmul %61, %62, %cst_45 {dimension_numbers = #tpu.dot_dimension_numbers<[1], [0], [0], [1], [0, 0, 1, 1], [], []>} : vector<16x64xbf16>, vector<64x64xbf16>, vector<16x64xf32> -> vector<16x64xf32>
    %c0_46 = arith.constant 0 : index
    %c0_47 = arith.constant 0 : index
    %64 = vector.load %arg15[%c0_46, %c0_47] : memref<1x64xf32, #tpu.memory_space<vmem>>, vector<1x64xf32>
    %65 = vector.broadcast %64 : vector<1x64xf32> to vector<16x64xf32>
    %66 = arith.addf %63, %65 : vector<16x64xf32>
    %cst_48 = arith.constant 0.000000e+00 : f32
    %67 = vector.broadcast %cst_48 : f32 to vector<16x64xf32>
    %68 = arith.maximumf %66, %67 : vector<16x64xf32>
    %69 = arith.truncf %68 : vector<16x64xf32> to vector<16x64xbf16>
    %c0_49 = arith.constant 0 : index
    %c0_50 = arith.constant 0 : index
    %70 = vector.load %arg16[%c0_49, %c0_50] : memref<64x32xbf16, #tpu.memory_space<vmem>>, vector<64x32xbf16>
    %cst_51 = arith.constant dense<0.000000e+00> : vector<16x32xf32>
    %71 = tpu.matmul %69, %70, %cst_51 {dimension_numbers = #tpu.dot_dimension_numbers<[1], [0], [0], [1], [0, 0, 1, 1], [], []>} : vector<16x64xbf16>, vector<64x32xbf16>, vector<16x32xf32> -> vector<16x32xf32>
    %c0_52 = arith.constant 0 : index
    %c0_53 = arith.constant 0 : index
    %72 = vector.load %arg17[%c0_52, %c0_53] : memref<1x32xf32, #tpu.memory_space<vmem>>, vector<1x32xf32>
    %73 = vector.broadcast %72 : vector<1x32xf32> to vector<16x32xf32>
    %74 = arith.addf %71, %73 : vector<16x32xf32>
    %75 = arith.truncf %74 : vector<16x32xf32> to vector<16x32xbf16>
    %c0_54 = arith.constant 0 : index
    %c128 = arith.constant 128 : index
    %76 = vector.load %arg18[%c0_54, %c128] : memref<16x256xbf16, #tpu.memory_space<vmem>>, vector<16x32xbf16>
    tpu.vector_store %arg18[%c0_54, %c128], %75 {strides = array<i32>} : memref<16x256xbf16, #tpu.memory_space<vmem>>, vector<16x32xbf16>,
    return
  }
  func.func @transform_0(%arg0: i32) -> (i32, i32) {
    %c0_i32 = arith.constant 0 : i32
    %c0_i32_0 = arith.constant 0 : i32
    return %arg0, %c0_i32 : i32, i32
  }
  func.func @transform_1(%arg0: i32) -> (i32, i32) {
    %c0_i32 = arith.constant 0 : i32
    %c0_i32_0 = arith.constant 0 : i32
    %c0_i32_1 = arith.constant 0 : i32
    return %c0_i32, %c0_i32_0 : i32, i32
  }
  func.func @transform_2(%arg0: i32) -> (i32, i32) {
    %c0_i32 = arith.constant 0 : i32
    %c0_i32_0 = arith.constant 0 : i32
    %c0_i32_1 = arith.constant 0 : i32
    return %c0_i32, %c0_i32_0 : i32, i32
  }
  func.func @transform_3(%arg0: i32) -> (i32, i32) {
    %c0_i32 = arith.constant 0 : i32
    %c0_i32_0 = arith.constant 0 : i32
    %c0_i32_1 = arith.constant 0 : i32
    return %c0_i32, %c0_i32_0 : i32, i32
  }
  func.func @transform_4(%arg0: i32) -> (i32, i32) {
    %c0_i32 = arith.constant 0 : i32
    %c0_i32_0 = arith.constant 0 : i32
    %c0_i32_1 = arith.constant 0 : i32
    return %c0_i32, %c0_i32_0 : i32, i32
  }
  func.func @transform_5(%arg0: i32) -> (i32, i32) {
    %c0_i32 = arith.constant 0 : i32
    %c0_i32_0 = arith.constant 0 : i32
    %c0_i32_1 = arith.constant 0 : i32
    return %c0_i32, %c0_i32_0 : i32, i32
  }
  func.func @transform_6(%arg0: i32) -> (i32, i32) {
    %c0_i32 = arith.constant 0 : i32
    %c0_i32_0 = arith.constant 0 : i32
    %c0_i32_1 = arith.constant 0 : i32
    return %c0_i32, %c0_i32_0 : i32, i32
  }
  func.func @transform_7(%arg0: i32) -> (i32, i32) {
    %c0_i32 = arith.constant 0 : i32
    %c0_i32_0 = arith.constant 0 : i32
    %c0_i32_1 = arith.constant 0 : i32
    return %c0_i32, %c0_i32_0 : i32, i32
  }
  func.func @transform_8(%arg0: i32) -> (i32, i32) {
    %c0_i32 = arith.constant 0 : i32
    %c0_i32_0 = arith.constant 0 : i32
    %c0_i32_1 = arith.constant 0 : i32
    return %c0_i32, %c0_i32_0 : i32, i32
  }
  func.func @transform_9(%arg0: i32) -> (i32, i32) {
    %c0_i32 = arith.constant 0 : i32
    %c0_i32_0 = arith.constant 0 : i32
    %c0_i32_1 = arith.constant 0 : i32
    return %c0_i32, %c0_i32_0 : i32, i32
  }
  func.func @transform_10(%arg0: i32) -> (i32, i32) {
    %c0_i32 = arith.constant 0 : i32
    %c0_i32_0 = arith.constant 0 : i32
    %c0_i32_1 = arith.constant 0 : i32
    return %c0_i32, %c0_i32_0 : i32, i32
  }
  func.func @transform_11(%arg0: i32) -> (i32, i32) {
    %c0_i32 = arith.constant 0 : i32
    %c0_i32_0 = arith.constant 0 : i32
    %c0_i32_1 = arith.constant 0 : i32
    return %c0_i32, %c0_i32_0 : i32, i32
  }
  func.func @transform_12(%arg0: i32) -> (i32, i32) {
    %c0_i32 = arith.constant 0 : i32
    %c0_i32_0 = arith.constant 0 : i32
    %c0_i32_1 = arith.constant 0 : i32
    return %c0_i32, %c0_i32_0 : i32, i32
  }
  func.func @transform_13(%arg0: i32) -> (i32, i32) {
    %c0_i32 = arith.constant 0 : i32
    %c0_i32_0 = arith.constant 0 : i32
    %c0_i32_1 = arith.constant 0 : i32
    return %c0_i32, %c0_i32_0 : i32, i32
  }
  func.func @transform_14(%arg0: i32) -> (i32, i32) {
    %c0_i32 = arith.constant 0 : i32
    %c0_i32_0 = arith.constant 0 : i32
    %c0_i32_1 = arith.constant 0 : i32
    return %c0_i32, %c0_i32_0 : i32, i32
  }
  func.func @transform_15(%arg0: i32) -> (i32, i32) {
    %c0_i32 = arith.constant 0 : i32
    %c0_i32_0 = arith.constant 0 : i32
    %c0_i32_1 = arith.constant 0 : i32
    return %c0_i32, %c0_i32_0 : i32, i32
  }
  func.func @transform_16(%arg0: i32) -> (i32, i32) {
    %c0_i32 = arith.constant 0 : i32
    %c0_i32_0 = arith.constant 0 : i32
    %c0_i32_1 = arith.constant 0 : i32
    return %c0_i32, %c0_i32_0 : i32, i32
  }
  func.func @transform_17(%arg0: i32) -> (i32, i32) {
    %c0_i32 = arith.constant 0 : i32
    %c0_i32_0 = arith.constant 0 : i32
    return %arg0, %c0_i32 : i32, i32
  }
}

</mosaic_0001>

<bundles_post_ra>
// kernel: tpu_custom_call.1
= control target key start
LH: loop header
LB: loop body
LE: loop exit
PB: predicated region body
PF: predicated region fallthrough
CT: control target
= control target key end

     0   :  { %s1380_s0 = inlined_call_operand.hbm [shape: bf16[16,32], index: 0, kind: input, shape index: {}]   ;;  %s1381_s1 = inlined_call_operand.vmem [shape: bf16[32,64], index: 1, kind: input, shape index: {}]   ;;  %s1382_s2 = inlined_call_operand.vmem [shape: f32[1,64], index: 2, kind: input, shape index: {}]   ;;  %s1383_s3 = inlined_call_operand.vmem [shape: bf16[64,64], index: 3, kind: input, shape index: {}]   ;;  %s1384_s4 = inlined_call_operand.vmem [shape: f32[1,64], index: 4, kind: input, shape index: {}]   ;;  %s1385_s5 = inlined_call_operand.vmem [shape: bf16[64,32], index: 5, kind: input, shape index: {}]   ;;  %s1386_s6 = inlined_call_operand.hbm [shape: f32[1,32], index: 6, kind: input, shape index: {}]   ;;  %s1387_s7 = inlined_call_operand.vmem [shape: bf16[32,8], index: 7, kind: input, shape index: {}]   ;;  %s1388_s8 = inlined_call_operand.vmem [shape: f32[1,8], index: 8, kind: input, shape index: {}]   ;;  %s1389_s9 = inlined_call_operand.vmem [shape: bf16[8,32], index: 9, kind: input, shape index: {}]   ;;  %s1390_s10 = inlined_call_operand.vmem [shape: f32[1,32], index: 10, kind: input, shape index: {}]   ;;  %s1391_s11 = inlined_call_operand.vmem [shape: bf16[32,64], index: 11, kind: input, shape index: {}]   ;;  %s1392_s12 = inlined_call_operand.vmem [shape: f32[1,64], index: 12, kind: input, shape index: {}]   ;;  %s1393_s13 = inlined_call_operand.vmem [shape: bf16[64,64], index: 13, kind: input, shape index: {}]   ;;  %s1394_s14 = inlined_call_operand.vmem [shape: f32[1,64], index: 14, kind: input, shape index: {}]   ;;  %s1395_s15 = inlined_call_operand.vmem [shape: bf16[64,32], index: 15, kind: input, shape index: {}]   ;;  %s1396_s16 = inlined_call_operand.vmem [shape: f32[1,32], index: 16, kind: input, shape index: {}]   ;;  %s1397_s17 = inlined_call_operand.hbm [shape: bf16[16,256], index: 17, kind: output, shape index: {}]  }
   0x1   :  { %1401 = sst [smem:[#allocation11_spill]] %s1380_s0 }
   0x2   :  { %1402 = sst [smem:[#allocation12_spill]] %s1381_s1 }
   0x3   :  { %1403 = sst [smem:[#allocation13_spill]] %s1397_s17 }
   0x4   :  { %22 = vsyncpa [#allocation3], 0 }
   0x5   :  { %23 = vsyncpa [#allocation6], 0 }
   0x6   :  { %24 = vsyncpa [#allocation4], 0  ;;  %s1085_s24 = smov [#allocation2]   ;;  %s1404_s28 = sld [smem:[#allocation11_spill]] }
   0x7   :  { %s30_s25 = sshll.u32 %s1085_s24, 4  ;;  %s31_s25 = int_to_ptr.vmem [resolvable:$true] %s30_s25 }
   0xc   :  { %s1013_s29 = scalar_lea.hbm %s1404_s28, 128 }
   0xd   :  { %p1014_p0 = scmp.ne.s32.totalorder %s1404_s28, %s1013_s29  ;;  %p1017_p1 = scmp.lt.u32.totalorder %s1013_s29, %s1404_s28 }
   0xf   :  { %p1019_p2 = pnand %p1017_p1, %p1014_p0 }
  0x11   :  { %1022 = shalt.err (!%p1019_p2)
}
  0x12   :  { %s1023_s1 = scalar_lea.vmem %s31_s25, 128  ;;  %p1028_p4 = scmp.lt.s32.totalorder %s31_s25, %s31_s25 }
  0x13   :  { %p1024_p3 = scmp.ne.s32.totalorder %s31_s25, %s1023_s1  ;;  %p1029_p5 = scmp.lt.s32.totalorder %s1023_s1, %s1023_s1 }
  0x15   :  { %p1030_p6 = por %p1029_p5, %p1028_p4 }
  0x17   :  { %p1031_p7 = pnand %p1030_p6, %p1024_p3 }
  0x19   :  { %1034 = shalt.err (!%p1031_p7)
}
  0x1a   :  { %s1086_s20 = smov 64   ;;  %s1087_s21 = smov 4  }
  0x1b   :  { %36 = dma.hbm_to_vmem [thread:$0]  %s1404_s28, 128, %s31_s25, [#allocation3], %s1086_s20, %s1086_s20, %s1087_s21  }
  0x1c   :  { %s1088_s24 = smov [#allocation5]   ;;  %s1035_s0 = scalar_lea.hbm %s1386_s6, 16 }
  0x1d   :  { %s53_s26 = sshll.u32 %s1088_s24, 4  ;;  %p1036_p8 = scmp.ne.s32.totalorder %s1386_s6, %s1035_s0  ;;  %s54_s26 = int_to_ptr.vmem [resolvable:$true] %s53_s26 }
  0x1e   :  { %p1039_p9 = scmp.lt.u32.totalorder %s1035_s0, %s1386_s6 }
  0x20   :  { %p1041_p10 = pnand %p1039_p9, %p1036_p8 }
  0x22   :  { %1044 = shalt.err (!%p1041_p10)
}
  0x23   :  { %s1045_s17 = scalar_lea.vmem %s54_s26, 16  ;;  %s1049_s25 = scalar_lea.vmem %s54_s26, 32 }
  0x24   :  { %p1046_p11 = scmp.ne.s32.totalorder %s54_s26, %s1045_s17  ;;  %p1050_p12 = scmp.lt.s32.totalorder %s54_s26, %s54_s26 }
  0x25   :  { %p1051_p13 = scmp.lt.s32.totalorder %s1049_s25, %s1045_s17 }
  0x27   :  { %p1052_p0 = por %p1051_p13, %p1050_p12 }
  0x29   :  { %p1053_p1 = pnand %p1052_p0, %p1046_p11 }
  0x2b   :  { %1056 = shalt.err (!%p1053_p1)
}
  0x2c   :  { %56 = dma.hbm_to_vmem [thread:$0]  %s1386_s6, 16, %s54_s26, [#allocation6]  }
  0x2d   :  { %1079 = dma.done.wait [#allocation3], 128  }
  0x2e   :  { %1080 = vsyncadd [#allocation3], 4294967168 }
  0x2f   :  { %1081 = dma.done.wait [#allocation6], 16  }
  0x30   :  { %1082 = vsyncadd [#allocation6], 4294967280  ;;  %v1089_v0 = vmov 0.0   ;;  %vm1090_vm0 = vmmov 0   ;;  %s1405_s23 = sld [smem:[#allocation12_spill]]  ;;  %v985_v3 = vld [vmem:[%s1383_s3] sm:$0xff]  }
  0x31   :  { %894 = vmatprep.subr.bf16.mxu0 %v1089_v0  ;;  %898 = vmatprep.mubr.msk.bf16.mxu0 %vm1090_vm0, %v1089_v0  ;;  %v984_v4 = vld [vmem:[#allocation2] sm:$0xff]   ;;  %vm114_vm1 = vcmask 261120   ;;  %v986_v5 = vld [vmem:[%s1383_s3 + $0x8] sm:$0xff]   ;;  %v987_v6 = vld [vmem:[%s1383_s3 + $0x10] sm:$0xff]   ;;  %vm169_vm2 = vcmask 519168   ;;  %vm211_vm3 = vcmask 523264  }
  0x32   :  { %902 = vmatprep.subr.bf16.mxu1 %v1089_v0  ;;  %910 = vmatprep.mubr.msk.bf16.mxu1 %vm1090_vm0, %v1089_v0  ;;  %v988_v7 = vld [vmem:[%s1383_s3 + $0x18] sm:$0xff]   ;;  %v989_v8 = vld [vmem:[%s1385_s5] sm:$0xff]   ;;  %v990_v9 = vld [vmem:[%s1385_s5 + $0x8] sm:$0xff]   ;;  %vm440_vm4 = vcmask 64512   ;;  %s1091_s18 = smov 32   ;;  %vm370_vm5 = vcmask 519424  }
  0x33   :  { %903 = vmatpush3.bf16.msra.mxu1 %v985_v3  ;;  %v806_v10 = vld [vmem:[%s1382_s2] ss:$0 sm:$0xff]  ;;  %v991_v22 = vld [vmem:[%s1385_s5 + $0x10] sm:$0xff]   ;;  %v992_v23 = vld [vmem:[%s1385_s5 + $0x18] sm:$0xff]   ;;  %vm270_vm6 = vcmask 1043968   ;;  %vm490_vm7 = vcmask 1043456  }
  0x34   :  { %904 = vmatprep.subr.bf16.mxu1 %v1089_v0  ;;  %v813_v24 = vld [vmem:[%s1384_s4] ss:$0 sm:$0xff]  ;;  %v994_v35 = vld [vmem:[%s1387_s7 + $0x8] sm:$0xff]   ;;  %vm785_vm8 = vcmask 257024  }
  0x35   :  { %v993_v34 = vld [vmem:[%s1387_s7] sm:$0xff]   ;;  %v821_v36 = vld [vmem:[#allocation5] ss:$0 sm:$0xff] }
  0x36   :  { %v982_v1 = vld [vmem:[%s1405_s23] sm:$0xff]   ;;  %v983_v2 = vld [vmem:[%s1405_s23 + $0x8] sm:$0xff]  }
  0x37   :  { %895 = vmatpush3.bf16.msra.mxu0 %v982_v1  ;;  %905 = vmatpush3.bf16.msra.mxu1 %v986_v5  ;;  %v829_v46 = vld [vmem:[%s1388_s8] ss:$0 sm:$0xff] }
  0x38   :  { %896 = vmatprep.subr.bf16.mxu0 %v1089_v0  ;;  %906 = vmatprep.subr.bf16.mxu1 %v1089_v0 }
  0x3b   :  { %897 = vmatpush3.bf16.msra.mxu0 %v983_v2  ;;  %907 = vmatpush3.bf16.msra.mxu1 %v987_v6 }
  0x3c   :  { %914 = vmatprep.subr.bf16.mxu0 %v1089_v0  ;;  %908 = vmatprep.subr.bf16.mxu1 %v1089_v0 }
  0x3e   :  { %899 = vmatmul.mubr.msk.bf16.vlgmr.msra.gmra.mrb[0].mxu0 %vm114_vm1, %v984_v4 }
  0x3f   :  { %922 = vmatprep.mubr.msk.bf16.mxu0 %vm1090_vm0, %v1089_v0  ;;  %909 = vmatpush3.bf16.msra.mxu1 %v988_v7  ;;  %v480_v7 = vld [vmem:[%s1389_s9] sm:$0xf] }
  0x40   :  { %926 = vmatprep.subr.bf16.mxu1 %v1089_v0  ;;  %915 = vmatpush3.bf16.msra.mxu0 %v989_v8  ;;  %v492_v8 = vsel %vm490_vm7, %v480_v7, 0 }
  0x41   :  { %916 = vmatprep.subr.bf16.mxu0 %v1089_v0 }
  0x44   :  { %917 = vmatpush3.bf16.msra.mxu0 %v990_v9 }
  0x45   :  { %918 = vmatprep.subr.bf16.mxu0 %v1089_v0 }
  0x48   :  { %919 = vmatpush3.bf16.msra.mxu0 %v991_v22  ;;  %v996_v22 = vld [vmem:[%s1391_s11 + $0x8] sm:$0xff]  }
  0x49   :  { %920 = vmatprep.subr.bf16.mxu0 %v1089_v0 }
  0x4c   :  { %921 = vmatpush3.bf16.msra.mxu0 %v992_v23  ;;  %v997_v23 = vld [vmem:[%s1393_s13] sm:$0xff]  }
  0x4d   :  { %934 = vmatprep.subr.bf16.mxu0 %v1089_v0 }
 0x111   :  { %v152_v11 = vpop.f32.mrb[0].mxu0 }
 0x112   :  { %v153_v12 = vadd.f32 %v806_v10, %v152_v11  ;;  %v900_v13 = vpop.f32.mrb[1].mxu0 }
 0x113   :  { %v155_v14 = vpop.f32.mrb[2].mxu0 }
 0x114   :  { %v159_v15 = vmax.f32 %v153_v12, 0.0  ;;  %v156_v16 = vadd.f32 %v806_v10, %v155_v14  ;;  %v901_v17 = vpop.f32.mrb[3].mxu0 }
 0x116   :  { %v855_v18 = vpack.c.bf16 %v159_v15, %v159_v15  ;;  %v160_v19 = vmax.f32 %v156_v16, 0.0 }
 0x118   :  { %v161_v20 = vpack.c.bf16 %v160_v19, %v159_v15  ;;  %v856_v21 = vpack.c.bf16 %v160_v19, %v160_v19  ;;  %170 = vst.msk [vmem:[#allocation7] sm:$0xf] %vm169_vm2, %v855_v18 }
 0x11a   :  { %911 = vmatmul.mubr.msk.bf16.vlgmr.msra.gmra.mrb[0].mxu1 %vm211_vm3, %v161_v20  ;;  %171 = vst.msk [vmem:[#allocation7 + $0x8] sm:$0xf] %vm169_vm2, %v856_v21  ;;  %v995_v21 = vld [vmem:[%s1391_s11] sm:$0xff]  }
 0x11b   :  { %930 = vmatprep.mubr.msk.bf16.mxu1 %vm1090_vm0, %v1089_v0  ;;  %927 = vmatpush3.bf16.msra.mxu1 %v993_v34 }
 0x11c   :  { %928 = vmatprep.subr.bf16.mxu1 %v1089_v0 }
 0x11f   :  { %929 = vmatpush3.bf16.msra.mxu1 %v994_v35 }
 0x120   :  { %940 = vmatprep.subr.bf16.mxu1 %v1089_v0 }
 0x1ed   :  { %v249_v25 = vpop.f32.mrb[0].mxu1 }
 0x1ee   :  { %v250_v26 = vadd.f32 %v813_v24, %v249_v25  ;;  %v912_v27 = vpop.f32.mrb[1].mxu1 }
 0x1ef   :  { %v252_v28 = vpop.f32.mrb[2].mxu1 }
 0x1f0   :  { %v253_v29 = vadd.f32 %v813_v24, %v252_v28  ;;  %v913_v30 = vpop.f32.mrb[3].mxu1  ;;  %v256_v31 = vmax.f32 %v250_v26, 0.0  ;;  %v998_v24 = vld [vmem:[%s1393_s13 + $0x8] sm:$0xff]   ;;  %v835_v28 = vld [vmem:[%s1390_s10] ss:$0 sm:$0xff] }
 0x1f2   :  { %v1269_v32 = vmax.f32 %v253_v29, 0.0  ;;  %v857_v56 = vpack.c.bf16 %v256_v31, %v256_v31 }
 0x1f4   :  { %v258_v33 = vpack.c.bf16 %v1269_v32, %v256_v31  ;;  %v858_v20 = vpack.c.bf16 %v1269_v32, %v1269_v32 }
 0x1f6   :  { %923 = vmatmul.mubr.msk.bf16.vlgmr.msra.gmra.mrb[4].mxu0 %vm211_vm3, %v258_v33 }
 0x1f7   :  { %936 = vmatprep.mubr.msk.bf16.mxu0 %vm1090_vm0, %v1089_v0  ;;  %935 = vmatpush3.bf16.msra.mxu0 %v492_v8 }
 0x1f8   :  { %948 = vmatprep.subr.bf16.mxu0 %v1089_v0 }
 0x2c9   :  { %v349_v37 = vpop.f32.mrb[4].mxu0 }
 0x2ca   :  { %v350_v38 = vadd.f32 %v821_v36, %v349_v37  ;;  %v924_v39 = vpop.f32.mrb[5].mxu0 }
 0x2cb   :  { %v352_v40 = vpop.f32.mrb[6].mxu0  ;;  %v1000_v39 = vld [vmem:[%s1393_s13 + $0x18] sm:$0xff]  }
 0x2cc   :  { %v353_v41 = vadd.f32 %v821_v36, %v352_v40  ;;  %v925_v42 = vpop.f32.mrb[7].mxu0  ;;  %v356_v43 = vmax.f32 %v350_v38, 0.0  ;;  %v999_v38 = vld [vmem:[%s1393_s13 + $0x10] sm:$0xff]   ;;  %v1001_v40 = vld [vmem:[%s1395_s15] sm:$0xff]  }
 0x2cd   :  { %v837_v42 = vld [vmem:[%s1392_s12] ss:$0 sm:$0xff] }
 0x2ce   :  { %v357_v44 = vmax.f32 %v353_v41, 0.0  ;;  %v859_v55 = vpack.c.bf16 %v356_v43, %v356_v43  ;;  %v1002_v41 = vld [vmem:[%s1395_s15 + $0x8] sm:$0xff]  }
 0x2d0   :  { %v358_v45 = vpack.c.bf16 %v357_v44, %v356_v43  ;;  %v860_v6 = vpack.c.bf16 %v357_v44, %v357_v44 }
 0x2d2   :  { %931 = vmatmul.mubr.msk.bf16.vlgmr.msra.gmra.mrb[4].mxu1 %vm114_vm1, %v358_v45 }
 0x2d3   :  { %944 = vmatprep.mubr.msk.bf16.mxu1 %vm1090_vm0, %v1089_v0  ;;  %941 = vmatpush3.bf16.msra.mxu1 %v995_v21 }
 0x2d4   :  { %942 = vmatprep.subr.bf16.mxu1 %v1089_v0 }
 0x2d7   :  { %943 = vmatpush3.bf16.msra.mxu1 %v996_v22 }
 0x2d8   :  { %960 = vmatprep.subr.bf16.mxu1 %v1089_v0 }
 0x3a5   :  { %v433_v47 = vpop.f32.mrb[4].mxu1 }
 0x3a6   :  { %v434_v48 = vadd.f32 %v829_v46, %v433_v47  ;;  %v932_v49 = vpop.f32.mrb[5].mxu1 }
 0x3a7   :  { %v436_v50 = vpop.f32.mrb[6].mxu1 }
 0x3a8   :  { %v437_v51 = vadd.f32 %v829_v46, %v436_v50  ;;  %v933_v52 = vpop.f32.mrb[7].mxu1  ;;  %v441_v53 = vsel %vm440_vm4, %v434_v48, -inf }
 0x3a9   :  { %442 = vmax.xlane.f32.xlu0 %v441_v53  ;;  %v1003_v52 = vld [vmem:[%s1395_s15 + $0x10] sm:$0xff]   ;;  %v1004_v53 = vld [vmem:[%s1395_s15 + $0x18] sm:$0xff]   ;;  %s1092_s15 = smov [#allocation7]  }
 0x3aa   :  { %v444_v54 = vsel %vm440_vm4, %v437_v51, -inf }
 0x3ad   :  { %445 = vmax.xlane.f32.xlu0 %v444_v54  ;;  %v841_v54 = vld [vmem:[%s1394_s14] ss:$0 sm:$0xff]  ;;  %s793_s14 = sshll.u32 %s1092_s15, 4  ;;  %s794_s14 = int_to_ptr.vmem [resolvable:$true] %s793_s14 }
 0x3ae   :  { %s1057_s9 = scalar_lea.vmem %s794_s14, 256  ;;  %p1062_p3 = scmp.lt.s32.totalorder %s794_s14, %s794_s14 }
 0x3af   :  { %p1058_p2 = scmp.ne.s32.totalorder %s794_s14, %s1057_s9  ;;  %p1063_p4 = scmp.lt.s32.totalorder %s1057_s9, %s1057_s9 }
 0x3b1   :  { %p1064_p5 = por %p1063_p4, %p1062_p3 }
 0x3b3   :  { %p1065_p6 = pnand %p1064_p5, %p1058_p2 }
 0x3c3   :  { %364 = vrot.lane.b32.xlu0 %v859_v55, %s1091_s18 }
 0x3c7   :  { %264 = vrot.lane.b32.xlu0 %v857_v56, %s1086_s20 }
 0x436   :  { %v443_v57 = vpop.xlane.xlu0 %442 }
 0x437   :  { %v447_v58 = vsub.f32 %v434_v48, %v443_v57 }
 0x439   :  { %v449_v59 = vmul.f32 1.442695, %v447_v58 }
 0x43a   :  { %v446_v60 = vpop.xlane.xlu0 %445 }
 0x43b   :  { %1005 = vpow2.f32 %v449_v59  ;;  %v448_v61 = vsub.f32 %v437_v51, %v446_v60 }
 0x43d   :  { %v451_v62 = vmul.f32 1.442695, %v448_v61 }
 0x43e   :  { %v365_v63 = vpop.permute.xlu0 %364 }
 0x43f   :  { %1007 = vpow2.f32 %v451_v62  ;;  %371 = vst.msk [vmem:[#allocation7 + $0x4] sm:$0xf] %vm370_vm5, %v365_v63 }
 0x442   :  { %v265_v1 = vpop.permute.xlu0 %264 }
 0x443   :  { %271 = vst.msk [vmem:[#allocation7] sm:$0xf] %vm270_vm6, %v265_v1 }
 0x445   :  { %v1006_v2 = vpop.eup %1005 }
 0x446   :  { %v453_v3 = vsel %vm440_vm4, %v1006_v2, 0.0 }
 0x447   :  { %454 = vadd.xlane.f32.xlu1 %v453_v3 }
 0x449   :  { %v1008_v4 = vpop.eup %1007 }
 0x44a   :  { %v456_v5 = vsel %vm440_vm4, %v1008_v4, 0.0 }
 0x44b   :  { %457 = vadd.xlane.f32.xlu1 %v456_v5 }
 0x45c   :  { %366 = vrot.lane.b32.xlu1 %v860_v6, %s1091_s18 }
 0x4d4   :  { %v455_v9 = vpop.xlane.xlu1 %454 }
 0x4d5   :  { %1009 = vrcp.f32 %v455_v9 }
 0x4d8   :  { %v458_v10 = vpop.xlane.xlu1 %457 }
 0x4d9   :  { %1011 = vrcp.f32 %v458_v10 }
 0x4dc   :  { %v367_v11 = vpop.permute.xlu1 %366 }
 0x4dd   :  { %372 = vst.msk [vmem:[#allocation7 + $0xc] sm:$0xf] %vm370_vm5, %v367_v11 }
 0x4df   :  { %v1010_v12 = vpop.eup %1009 }
 0x4e0   :  { %v460_v14 = vmul.f32 %v1010_v12, %v1006_v2 }
 0x4e3   :  { %v1012_v13 = vpop.eup %1011 }
 0x4e4   :  { %v462_v15 = vmul.f32 %v1012_v13, %v1008_v4 }
 0x4e6   :  { %v463_v16 = vpack.c.bf16 %v462_v15, %v460_v14 }
 0x4e8   :  { %937 = vmatmul.mubr.msk.bf16.vlgmr.msra.gmra.mrb[8].mxu0 %vm440_vm4, %v463_v16  ;;  %v466_v17 = vsel %vm440_vm4, %v463_v16, 0 }
 0x4e9   :  { %v833_v18 = vcombine.low %v466_v17, %v466_v17  ;;  %956 = vmatprep.mubr.msk.bf16.mxu0 %vm1090_vm0, %v1089_v0  ;;  %v834_v19 = vcombine.high %v466_v17, %v466_v17  ;;  %949 = vmatpush3.bf16.msra.mxu0 %v997_v23 }
 0x4ea   :  { %950 = vmatprep.subr.bf16.mxu0 %v1089_v0 }
 0x4eb   :  { %472 = vrot.lane.b32.xlu1 %v833_v18, %s1086_s20 }
 0x4ed   :  { %951 = vmatpush3.bf16.msra.mxu0 %v998_v24 }
 0x4ee   :  { %952 = vmatprep.subr.bf16.mxu0 %v1089_v0 }
 0x4ef   :  { %474 = vrot.lane.b32.xlu1 %v834_v19, %s1086_s20 }
 0x4f1   :  { %953 = vmatpush3.bf16.msra.mxu0 %v999_v38 }
 0x4f2   :  { %954 = vmatprep.subr.bf16.mxu0 %v1089_v0 }
 0x4f3   :  { %266 = vrot.lane.b32.xlu1 %v858_v20, %s1086_s20 }
 0x4f5   :  { %955 = vmatpush3.bf16.msra.mxu0 %v1000_v39 }
 0x55d   :  { %v473_v25 = vpop.permute.xlu1 %472 }
 0x55e   :  { %478 = vst.msk [vmem:[#allocation7 + $0x4] sm:$0xf] %vm270_vm6, %v473_v25 }
 0x561   :  { %v475_v26 = vpop.permute.xlu1 %474 }
 0x562   :  { %479 = vst.msk [vmem:[#allocation7 + $0xc] sm:$0xf] %vm270_vm6, %v475_v26 }
 0x565   :  { %v267_v27 = vpop.permute.xlu1 %266 }
 0x566   :  { %272 = vst.msk [vmem:[#allocation7 + $0x8] sm:$0xf] %vm270_vm6, %v267_v27 }
 0x5bb   :  { %v528_v29 = vpop.f32.mrb[8].mxu0 }
 0x5bc   :  { %v529_v30 = vadd.f32 %v835_v28, %v528_v29  ;;  %v938_v31 = vpop.f32.mrb[9].mxu0 }
 0x5bd   :  { %v531_v32 = vpop.f32.mrb[10].mxu0 }
 0x5be   :  { %v532_v33 = vadd.f32 %v835_v28, %v531_v32  ;;  %v939_v34 = vpop.f32.mrb[11].mxu0  ;;  %v535_v35 = vmax.f32 %v529_v30, 0.0 }
 0x5c0   :  { %v536_v36 = vmax.f32 %v532_v33, 0.0 }
 0x5c2   :  { %v537_v37 = vpack.c.bf16 %v536_v36, %v535_v35 }
 0x5c4   :  { %945 = vmatmul.mubr.msk.bf16.vlgmr.msra.gmra.mrb[8].mxu1 %vm114_vm1, %v537_v37 }
 0x5c5   :  { %968 = vmatprep.mubr.msk.bf16.mxu1 %vm1090_vm0, %v1089_v0  ;;  %961 = vmatpush3.bf16.msra.mxu1 %v1001_v40 }
 0x5c6   :  { %962 = vmatprep.subr.bf16.mxu1 %v1089_v0 }
 0x5c9   :  { %963 = vmatpush3.bf16.msra.mxu1 %v1002_v41 }
 0x5ca   :  { %964 = vmatprep.subr.bf16.mxu1 %v1089_v0 }
 0x5cd   :  { %965 = vmatpush3.bf16.msra.mxu1 %v1003_v52 }
 0x5ce   :  { %966 = vmatprep.subr.bf16.mxu1 %v1089_v0  ;;  %v847_v0 = vld [vmem:[%s1396_s16] ss:$0 sm:$0xff] }
 0x5d1   :  { %967 = vmatpush3.bf16.msra.mxu1 %v1004_v53 }
 0x697   :  { %v598_v43 = vpop.f32.mrb[8].mxu1 }
 0x698   :  { %v599_v44 = vadd.f32 %v837_v42, %v598_v43  ;;  %v946_v45 = vpop.f32.mrb[9].mxu1 }
 0x699   :  { %v601_v46 = vpop.f32.mrb[10].mxu1 }
 0x69a   :  { %v602_v47 = vadd.f32 %v837_v42, %v601_v46  ;;  %v947_v48 = vpop.f32.mrb[11].mxu1  ;;  %v605_v49 = vmax.f32 %v599_v44, 0.0 }
 0x69c   :  { %v606_v50 = vmax.f32 %v602_v47, 0.0 }
 0x69e   :  { %v607_v51 = vpack.c.bf16 %v606_v50, %v605_v49 }
 0x6a0   :  { %957 = vmatmul.mubr.msk.bf16.vlgmr.msra.gmra.mrb[12].mxu0 %vm211_vm3, %v607_v51 }
 0x773   :  { %v684_v55 = vpop.f32.mrb[12].mxu0 }
 0x774   :  { %v685_v56 = vadd.f32 %v841_v54, %v684_v55  ;;  %v958_v57 = vpop.f32.mrb[13].mxu0 }
 0x775   :  { %v687_v58 = vpop.f32.mrb[14].mxu0 }
 0x776   :  { %v688_v59 = vadd.f32 %v841_v54, %v687_v58  ;;  %v959_v60 = vpop.f32.mrb[15].mxu0  ;;  %v691_v61 = vmax.f32 %v685_v56, 0.0 }
 0x778   :  { %v692_v62 = vmax.f32 %v688_v59, 0.0 }
 0x77a   :  { %v693_v63 = vpack.c.bf16 %v692_v62, %v691_v61 }
 0x77c   :  { %969 = vmatmul.mubr.msk.bf16.vlgmr.msra.gmra.mrb[12].mxu1 %vm211_vm3, %v693_v63 }
 0x84f   :  { %v770_v1 = vpop.f32.mrb[12].mxu1 }
 0x850   :  { %v771_v2 = vadd.f32 %v847_v0, %v770_v1  ;;  %v970_v3 = vpop.f32.mrb[13].mxu1 }
 0x851   :  { %v773_v4 = vpop.f32.mrb[14].mxu1 }
 0x852   :  { %v861_v5 = vpack.c.bf16 %v771_v2, %v771_v2  ;;  %v774_v6 = vadd.f32 %v847_v0, %v773_v4  ;;  %v971_v7 = vpop.f32.mrb[15].mxu1 }
 0x854   :  { %786 = vst.msk [vmem:[#allocation7 + $0x4] sm:$0xf] %vm785_vm8, %v861_v5  ;;  %v862_v8 = vpack.c.bf16 %v774_v6, %v774_v6 }
 0x856   :  { %787 = vst.msk [vmem:[#allocation7 + $0xc] sm:$0xf] %vm785_vm8, %v862_v8 }
 0x857   :  { %1068 = shalt.err (!%p1065_p6)
}
 0x858   :  { %s1406_s25 = sld [smem:[#allocation13_spill]] }
 0x85e   :  { %s1069_s28 = scalar_lea.hbm %s1406_s25, 256 }
 0x85f   :  { %p1070_p7 = scmp.ne.s32.totalorder %s1406_s25, %s1069_s28  ;;  %p1073_p8 = scmp.lt.u32.totalorder %s1069_s28, %s1406_s25 }
 0x861   :  { %p1075_p9 = pnand %p1073_p8, %p1070_p7 }
 0x863   :  { %1078 = shalt.err (!%p1075_p9)
}
 0x864   :  { %s1093_s11 = smov 128   ;;  %s1094_s23 = smov 8  }
 0x865   :  { %799 = dma.vmem_to_hbm [thread:$0]  %s794_s14, 256, %s1406_s25, [#allocation4], %s1093_s11, %s1093_s11, %s1094_s23  }
 0x866   :  { %1083 = dma.done.wait [#allocation4], 256  }
 0x867   :  { %1084 = vsyncadd [#allocation4], 4294967040 }
 0x868   :  { %803 = vsyncpa [#allocation3], 1 }
 0x869   :  { %804 = vsyncpa [#allocation6], 1 }
 0x86a   :  { %805 = vsyncpa [#allocation4], 1 }

</bundles_post_ra>
